<compile_context>
chip_gen: v5e
topology: v5e:2x2
jax: 0.10.0
libtpu: 0.0.40
codegen_flags: <defaults>
</compile_context>

<pallas_src>
import functools

import jax
import jax.numpy as jnp
from jax import lax
from jax.experimental import pallas as pl
from jax.experimental.pallas import tpu as pltpu


def _round_up(n, m):
    return (n + m - 1) // m * m


def _csc_aggregate_kernel(src_ref, dst_ref, x_ref, out_ref, acc_ref, *, tm, te):
    """One grid step: scatter-add one chunk of `te` edges into one (tm, tf)
    output block of target-node features, entirely on the MXU.

    src_ref : (te, 1)  int32 VMEM — source node id per edge of this chunk
    dst_ref : (1, te)  int32 VMEM — destination node id per edge (-1 = padding)
    x_ref   : (num_src_pad, tf)   — source-feature slab for this feature block
    out_ref : (tm, tf)            — output block for this dst block
    acc_ref : (tm, tf) f32 scratch accumulator (resident across edge chunks)
    """
    i = pl.program_id(0)          # dst-block index
    k = pl.program_id(2)          # edge-chunk index (reduction axis)

    @pl.when(k == 0)
    def _():
        acc_ref[...] = jnp.zeros_like(acc_ref)

    num_src = x_ref.shape[0]

    # Gather x[src[e]] for all edges of the chunk with a one-hot matmul.
    src_col = src_ref[...]                                       # (te, 1)
    s_iota = lax.broadcasted_iota(jnp.int32, (te, num_src), 1)
    gather = (src_col == s_iota).astype(x_ref.dtype)             # (te, num_src)
    x_chunk = jnp.dot(gather, x_ref[...],
                      preferred_element_type=jnp.float32)        # (te, tf) f32

    # Scatter into the tm target rows of this block with a selection matmul.
    dst_row = dst_ref[...]                                       # (1, te)
    t_iota = lax.broadcasted_iota(jnp.int32, (tm, te), 0) + i * tm
    select = (dst_row == t_iota).astype(jnp.float32)             # (tm, te)
    acc_ref[...] += jnp.dot(select, x_chunk,
                            preferred_element_type=jnp.float32)

    @pl.when(k == pl.num_programs(2) - 1)
    def _():
        out_ref[...] = acc_ref[...].astype(out_ref.dtype)


def cugraph_forward(x, csc, *, num_dst_nodes, max_num_neighbors=None,
                    tm=128, te=128, tf=128):
    """Pallas equivalent of CuGraphModule.forward: CSC neighbor sum-aggregation.

    x      : [num_src_nodes, feat] node features
    csc    : (row, colptr) int tensors, as produced by `to_csc`
    returns: [num_dst_nodes, feat] aggregated target-node features
    """
    del max_num_neighbors  # cugraph-specific perf hint; not needed on TPU
    row, colptr = csc
    num_src, feat = x.shape
    num_edges = int(row.shape[0])

    # --- glue: CSC -> per-edge destination ids (edges are already dst-sorted)
    row = row.astype(jnp.int32)
    colptr = colptr.astype(jnp.int32)
    edge_pos = jnp.arange(num_edges, dtype=jnp.int32)
    dst = (jnp.searchsorted(colptr, edge_pos, side="right") - 1).astype(jnp.int32)

    # --- pad everything to TPU-friendly sizes
    num_src_p = _round_up(max(num_src, 8), 8)
    feat_p = _round_up(feat, tf)
    num_dst_p = _round_up(max(num_dst_nodes, tm), tm)
    num_edges_p = _round_up(max(num_edges, te), te)

    x_p = jnp.zeros((num_src_p, feat_p), x.dtype).at[:num_src, :feat].set(x)
    src_p = jnp.zeros((num_edges_p,), jnp.int32).at[:num_edges].set(row)
    dst_p = jnp.full((num_edges_p,), -1, jnp.int32).at[:num_edges].set(dst)

    src_col = src_p.reshape(num_edges_p, 1)    # (E, 1): broadcasts over lanes
    dst_rowv = dst_p.reshape(1, num_edges_p)   # (1, E): broadcasts over sublanes

    grid = (num_dst_p // tm, feat_p // tf, num_edges_p // te)
    kernel = functools.partial(_csc_aggregate_kernel, tm=tm, te=te)

    out_p = pl.pallas_call(
        kernel,
        out_shape=jax.ShapeDtypeStruct((num_dst_p, feat_p), x.dtype),
        grid_spec=pltpu.PrefetchScalarGridSpec(
            num_scalar_prefetch=0,
            grid=grid,
            in_specs=[
                pl.BlockSpec((te, 1), lambda i, j, k: (k, 0)),          # src ids
                pl.BlockSpec((1, te), lambda i, j, k: (0, k)),          # dst ids
                pl.BlockSpec((num_src_p, tf), lambda i, j, k: (0, j)),  # x slab
            ],
            out_specs=pl.BlockSpec((tm, tf), lambda i, j, k: (i, j)),
            scratch_shapes=[pltpu.VMEM((tm, tf), jnp.float32)],
        ),
        compiler_params=pltpu.CompilerParams(
            dimension_semantics=("parallel", "parallel", "arbitrary"),
            vmem_limit_bytes=64 * 1024 * 1024,
        ),
    )(src_col, dst_rowv, x_p)

    return out_p[:num_dst_nodes, :feat]


def to_csc(edge_index, num_dst_nodes):
    """JAX port of CuGraphModule.to_csc (glue, not the hot path)."""
    row, col = edge_index
    perm = jnp.argsort(col)
    row_sorted = row[perm]
    counts = jnp.bincount(col[perm], length=num_dst_nodes)
    colptr = jnp.concatenate(
        [jnp.zeros((1,), jnp.int32), jnp.cumsum(counts).astype(jnp.int32)])
    return row_sorted.astype(jnp.int32), colptr


if __name__ == "__main__":
    key = jax.random.PRNGKey(0)
    k_x, k_row, k_col = jax.random.split(key, 3)

    num_src, num_dst, feat, num_edges = 32, 16, 128, 64

    x = jax.random.normal(k_x, (num_src, feat), dtype=jnp.float32)
    src = jax.random.randint(k_row, (num_edges,), 0, num_src, dtype=jnp.int32)
    dst = jax.random.randint(k_col, (num_edges,), 0, num_dst, dtype=jnp.int32)

    row, colptr = to_csc((src, dst), num_dst)

    out = cugraph_forward(x, (row, colptr), num_dst_nodes=num_dst)
    out = jax.block_until_ready(out)

    # pure-JAX reference: segment-sum of gathered source features
    ref = jax.ops.segment_sum(x[src], dst, num_segments=num_dst)

    assert out.shape == (num_dst, feat)
    assert jnp.allclose(out, ref, atol=1e-4, rtol=1e-4), "mismatch vs reference"
    # TODO(synk): forward() in the PyTorch base class is abstract; concrete
    # subclasses add learnable weights on top of this aggregation primitive.
    print("KERNEL_OK")
</pallas_src>

<mosaic_0001>
module attributes {stable_mosaic.version = 11 : i64} {
  func.func @_csc_aggregate_kernel(%arg0: i32, %arg1: i32, %arg2: i32, %arg3: memref<128x1xi32, #tpu.memory_space<vmem>>, %arg4: memref<1x128xi32, #tpu.memory_space<vmem>>, %arg5: memref<32x128xf32, #tpu.memory_space<vmem>>, %arg6: memref<128x128xf32, #tpu.memory_space<vmem>>, %arg7: memref<128x128xf32, #tpu.memory_space<vmem>>) attributes {dimension_semantics = [#tpu.dimension_semantics<parallel>, #tpu.dimension_semantics<parallel>, #tpu.dimension_semantics<arbitrary>], iteration_bounds = array<i64: 1, 1, 1>, scalar_prefetch = 0 : i64, scratch_operands = 1 : i64, tpu.core_type = #tpu.core_type<tc>, window_params = [{transform_indices = @transform_0, window_bounds = array<i64: 128, 1>}, {transform_indices = @transform_1, window_bounds = array<i64: 1, 128>}, {transform_indices = @transform_2, window_bounds = array<i64: 32, 128>}, {transform_indices = @transform_3, window_bounds = array<i64: 128, 128>}]} {
    %c0_i32 = arith.constant 0 : i32
    %0 = arith.cmpi eq, %arg2, %c0_i32 : i32
    %1 = arith.extui %0 : i1 to i32
    %c0_i32_0 = arith.constant 0 : i32
    %2 = arith.cmpi ne, %1, %c0_i32_0 : i32
    scf.if %2 {
      %cst_13 = arith.constant 0.000000e+00 : f32
      %27 = vector.broadcast %cst_13 : f32 to vector<128x128xf32>
      %c0_14 = arith.constant 0 : index
      %c0_15 = arith.constant 0 : index
      %28 = vector.load %arg7[%c0_14, %c0_15] : memref<128x128xf32, #tpu.memory_space<vmem>>, vector<128x128xf32>
      tpu.vector_store %arg7[%c0_14, %c0_15], %27 {strides = array<i32>} : memref<128x128xf32, #tpu.memory_space<vmem>>, vector<128x128xf32>,
    } else {
    }
    %c0 = arith.constant 0 : index
    %c0_1 = arith.constant 0 : index
    %3 = vector.load %arg3[%c0, %c0_1] : memref<128x1xi32, #tpu.memory_space<vmem>>, vector<128x1xi32>
    %4 = tpu.iota {dimensions = array<i32: 1>} : vector<128x32xi32>
    %5 = vector.broadcast %3 : vector<128x1xi32> to vector<128x32xi32>
    %6 = arith.cmpi eq, %5, %4 : vector<128x32xi32>
    %7 = arith.extui %6 : vector<128x32xi1> to vector<128x32xi32>
    %8 = arith.sitofp %7 : vector<128x32xi32> to vector<128x32xf32>
    %c0_2 = arith.constant 0 : index
    %c0_3 = arith.constant 0 : index
    %9 = vector.load %arg5[%c0_2, %c0_3] : memref<32x128xf32, #tpu.memory_space<vmem>>, vector<32x128xf32>
    %cst = arith.constant dense<0.000000e+00> : vector<128x128xf32>
    %10 = tpu.matmul %8, %9, %cst {dimension_numbers = #tpu.dot_dimension_numbers<[1], [0], [0], [1], [0, 0, 1, 1], [], []>} : vector<128x32xf32>, vector<32x128xf32>, vector<128x128xf32> -> vector<128x128xf32>
    %c0_4 = arith.constant 0 : index
    %c0_5 = arith.constant 0 : index
    %11 = vector.load %arg4[%c0_4, %c0_5] : memref<1x128xi32, #tpu.memory_space<vmem>>, vector<1x128xi32>
    %12 = tpu.iota {dimensions = array<i32: 0>} : vector<128x128xi32>
    %c128_i32 = arith.constant 128 : i32
    %13 = arith.muli %arg0, %c128_i32 : i32
    %14 = vector.broadcast %13 : i32 to vector<128x128xi32>
    %15 = arith.addi %12, %14 : vector<128x128xi32>
    %16 = vector.broadcast %11 : vector<1x128xi32> to vector<128x128xi32>
    %17 = arith.cmpi eq, %16, %15 : vector<128x128xi32>
    %18 = arith.extui %17 : vector<128x128xi1> to vector<128x128xi32>
    %19 = arith.sitofp %18 : vector<128x128xi32> to vector<128x128xf32>
    %c0_6 = arith.constant 0 : index
    %c0_7 = arith.constant 0 : index
    %20 = vector.load %arg7[%c0_6, %c0_7] : memref<128x128xf32, #tpu.memory_space<vmem>>, vector<128x128xf32>
    %cst_8 = arith.constant dense<0.000000e+00> : vector<128x128xf32>
    %21 = tpu.matmul %19, %10, %cst_8 {dimension_numbers = #tpu.dot_dimension_numbers<[1], [0], [0], [1], [0, 0, 1, 1], [], []>} : vector<128x128xf32>, vector<128x128xf32>, vector<128x128xf32> -> vector<128x128xf32>
    %22 = arith.addf %20, %21 : vector<128x128xf32>
    %c0_9 = arith.constant 0 : index
    %c0_10 = arith.constant 0 : index
    %23 = vector.load %arg7[%c0_9, %c0_10] : memref<128x128xf32, #tpu.memory_space<vmem>>, vector<128x128xf32>
    tpu.vector_store %arg7[%c0_9, %c0_10], %22 {strides = array<i32>} : memref<128x128xf32, #tpu.memory_space<vmem>>, vector<128x128xf32>,
    %c0_i32_11 = arith.constant 0 : i32
    %24 = arith.cmpi eq, %arg2, %c0_i32_11 : i32
    %25 = arith.extui %24 : i1 to i32
    %c0_i32_12 = arith.constant 0 : i32
    %26 = arith.cmpi ne, %25, %c0_i32_12 : i32
    scf.if %26 {
      %c0_13 = arith.constant 0 : index
      %c0_14 = arith.constant 0 : index
      %27 = vector.load %arg7[%c0_13, %c0_14] : memref<128x128xf32, #tpu.memory_space<vmem>>, vector<128x128xf32>
      %c0_15 = arith.constant 0 : index
      %c0_16 = arith.constant 0 : index
      %28 = vector.load %arg6[%c0_15, %c0_16] : memref<128x128xf32, #tpu.memory_space<vmem>>, vector<128x128xf32>
      tpu.vector_store %arg6[%c0_15, %c0_16], %27 {strides = array<i32>} : memref<128x128xf32, #tpu.memory_space<vmem>>, vector<128x128xf32>,
    } else {
    }
    return
  }
  func.func @transform_0(%arg0: i32, %arg1: i32, %arg2: i32) -> (i32, i32) {
    %c0_i32 = arith.constant 0 : i32
    %c0_i32_0 = arith.constant 0 : i32
    return %arg2, %c0_i32 : i32, i32
  }
  func.func @transform_1(%arg0: i32, %arg1: i32, %arg2: i32) -> (i32, i32) {
    %c0_i32 = arith.constant 0 : i32
    %c0_i32_0 = arith.constant 0 : i32
    return %c0_i32, %arg2 : i32, i32
  }
  func.func @transform_2(%arg0: i32, %arg1: i32, %arg2: i32) -> (i32, i32) {
    %c0_i32 = arith.constant 0 : i32
    %c0_i32_0 = arith.constant 0 : i32
    return %c0_i32, %arg1 : i32, i32
  }
  func.func @transform_3(%arg0: i32, %arg1: i32, %arg2: i32) -> (i32, i32) {
    %c0_i32 = arith.constant 0 : i32
    return %arg0, %arg1 : i32, i32
  }
}

</mosaic_0001>

<bundles_post_ra>
// kernel: tpu_custom_call.1
= control target key start
LH: loop header
LB: loop body
LE: loop exit
PB: predicated region body
PF: predicated region fallthrough
CT: control target
= control target key end

     0   :  { %v654_v2 = vmov 0   ;;  %s769_s0 = inlined_call_operand.vmem [shape: s32[128,1], index: 0, kind: input, shape index: {}]   ;;  %s770_s1 = inlined_call_operand.vmem [shape: s32[1,128], index: 1, kind: input, shape index: {}]   ;;  %s771_s2 = inlined_call_operand.vmem [shape: f32[32,128], index: 2, kind: input, shape index: {}]   ;;  %s772_s3 = inlined_call_operand.hbm [shape: f32[128,128], index: 3, kind: output, shape index: {}]  }
   0x1   :  { %v45_v0 = vld [vmem:[%s769_s0 + $0x50] sm:$0xff]  ;;  %v35_v1 = vld [vmem:[%s769_s0] sm:$0xff]  ;;  %625 = vset.pattern.permute.xlu1 %v654_v2  ;;  %624 = vset.pattern.permute.xlu0 %v654_v2  ;;  %v46_v3 = vld [vmem:[%s769_s0 + $0x58] sm:$0xff] }
   0x2   :  { %84 = vperm.xlu1 %625, %v45_v0   ;;  %54 = vperm.xlu0 %624, %v35_v1  }
   0x3   :  { %626 = vset.pattern.permute.xlu2 %v654_v2 }
   0x4   :  { %87 = vperm.xlu2 %626, %v46_v3  }
   0x5   :  { %8 = vsyncpa [#allocation4], 0  ;;  %v37_v4 = vld [vmem:[%s769_s0 + $0x10] sm:$0xff]  ;;  %v36_v5 = vld [vmem:[%s769_s0 + $0x8] sm:$0xff]  ;;  %v51_v23 = vlaneseq  ;;  %vm153_vm0 = vcmask 261120   ;;  %v655_v28 = vmov 0.0  }
   0x6   :  { %v38_v6 = vld [vmem:[%s769_s0 + $0x18] sm:$0xff]  ;;  %v39_v7 = vld [vmem:[%s769_s0 + $0x20] sm:$0xff]  ;;  %v48_v9 = vld [vmem:[%s769_s0 + $0x68] sm:$0xff]  ;;  %s506_s28 = sshll.u32 %s772_s3, 4  ;;  %s658_s29 = smov 128   ;;  %s507_s28 = int_to_ptr.hbm [resolvable:$true] %s506_s28 }
   0x7   :  { %v47_v8 = vld [vmem:[%s769_s0 + $0x60] sm:$0xff]  ;;  %v49_v10 = vld [vmem:[%s769_s0 + $0x70] sm:$0xff]  ;;  %v40_v11 = vld [vmem:[%s769_s0 + $0x28] sm:$0xff]  ;;  %v52_v25 = vand.u32 127, %v51_v23  ;;  %s659_s30 = smov 8  }
   0x8   :  { %v41_v12 = vld [vmem:[%s769_s0 + $0x30] sm:$0xff]  ;;  %v42_v13 = vld [vmem:[%s769_s0 + $0x38] sm:$0xff]  ;;  %v43_v15 = vld [vmem:[%s769_s0 + $0x40] sm:$0xff] }
   0x9   :  { %v50_v14 = vld [vmem:[%s769_s0 + $0x78] sm:$0xff]  ;;  %v44_v16 = vld [vmem:[%s769_s0 + $0x48] sm:$0xff]  ;;  %v151_v18 = vld [vmem:[%s771_s2 + $0x10] sm:$0xff] }
   0xa   :  { %60 = vperm.xlu1 %625, %v37_v4   ;;  %57 = vperm.xlu0 %624, %v36_v5   ;;  %v152_v17 = vld [vmem:[%s771_s2 + $0x18] sm:$0xff]  ;;  %v150_v19 = vld [vmem:[%s771_s2 + $0x8] sm:$0xff]  ;;  %v149_v20 = vld [vmem:[%s771_s2] sm:$0xff] }
   0xb   :  { %214 = vmatpush.msra.mxu0 %v152_v17  ;;  %582 = vmatpush.msra.mxu3 %v152_v17 }
   0xc   :  { %63 = vperm.xlu2 %626, %v38_v6  }
   0xd   :  { %215 = vmatpush.msra.mxu0 %v151_v18  ;;  %583 = vmatpush.msra.mxu3 %v151_v18 }
   0xf   :  { %216 = vmatpush.msra.mxu0 %v150_v19  ;;  %584 = vmatpush.msra.mxu3 %v150_v19 }
  0x11   :  { %217 = vmatpush.msra.mxu0 %v149_v20  ;;  %585 = vmatpush.msra.mxu3 %v149_v20 }
  0x12   :  { %66 = vperm.xlu1 %625, %v39_v7   ;;  %90 = vperm.xlu0 %624, %v47_v8   ;;  %v269_v8 = vshrl.u32 %v51_v23, 7 }
  0x14   :  { %93 = vperm.xlu2 %626, %v48_v9   ;;  %v276_v9 = vadd.s32 56, %v269_v8  ;;  %v284_v17 = vadd.s32 120, %v269_v8  ;;  %v279_v18 = vadd.s32 80, %v269_v8  ;;  %v272_v19 = vadd.s32 24, %v269_v8 }
  0x15   :  { %v280_v20 = vadd.s32 88, %v269_v8  ;;  %v274_v23 = vadd.s32 40, %v269_v8 }
  0x1a   :  { %96 = vperm.xlu1 %625, %v49_v10   ;;  %69 = vperm.xlu0 %624, %v40_v11   ;;  %v627_v10 = vld [vmem:[%s770_s1] ss:$0 sm:$0xff]  ;;  %v656_v11 = vmov 1.0   ;;  %s657_s1 = smov [#allocation3]  }
  0x1b   :  { %s504_s25 = sshll.u32 %s657_s1, 4  ;;  %s505_s25 = int_to_ptr.vmem [resolvable:$true] %s504_s25 }
  0x1c   :  { %72 = vperm.xlu2 %626, %v41_v12   ;;  %v277_v12 = vadd.s32 64, %v269_v8 }
  0x22   :  { %75 = vperm.xlu1 %625, %v42_v13   ;;  %99 = vperm.xlu0 %624, %v50_v14   ;;  %v270_v13 = vadd.s32 8, %v269_v8  ;;  %v283_v14 = vadd.s32 112, %v269_v8 }
  0x24   :  { %78 = vperm.xlu2 %626, %v43_v15   ;;  %v278_v15 = vadd.s32 72, %v269_v8 }
  0x2a   :  { %81 = vperm.xlu0 %624, %v44_v16   ;;  %v271_v16 = vadd.s32 16, %v269_v8 }
  0x5e   :  { %v88_v21 = vpop.permute.xlu2 %87 }
  0x5f   :  { %vm112_vm3 = vcmp.eq.s32.totalorder %v88_v21, %v52_v25  ;;  %v273_v21 = vadd.s32 32, %v269_v8 }
  0x60   :  { %v529_v32 = vsel %vm112_vm3, 1.0, %v655_v28  ;;  %vm312_vm3 = vcmp.eq.s32.totalorder %v627_v10, %v277_v12 }
  0x66   :  { %v64_v22 = vpop.permute.xlu2 %63 }
  0x67   :  { %vm104_vm8 = vcmp.eq.s32.totalorder %v64_v22, %v52_v25  ;;  %v281_v22 = vadd.s32 96, %v269_v8 }
  0x68   :  { %v521_v43 = vsel %vm104_vm8, 1.0, %v655_v28  ;;  %vm319_vm8 = vcmp.eq.s32.totalorder %v627_v10, %v284_v17 }
  0x6e   :  { %v94_v24 = vpop.permute.xlu2 %93 }
  0x6f   :  { %vm114_vm9 = vcmp.eq.s32.totalorder %v94_v24, %v52_v25  ;;  %v282_v24 = vadd.s32 104, %v269_v8 }
  0x70   :  { %v531_v44 = vsel %vm114_vm9, 1.0, %v655_v28  ;;  %vm314_vm9 = vcmp.eq.s32.totalorder %v627_v10, %v279_v18 }
  0x74   :  { %v85_v26 = vpop.permute.xlu1 %84  ;;  %v55_v27 = vpop.permute.xlu0 %54 }
  0x75   :  { %vm111_vm1 = vcmp.eq.s32.totalorder %v85_v26, %v52_v25  ;;  %vm101_vm2 = vcmp.eq.s32.totalorder %v55_v27, %v52_v25 }
  0x76   :  { %v528_v29 = vsel %vm111_vm1, 1.0, %v655_v28  ;;  %v518_v30 = vsel %vm101_vm2, 1.0, %v655_v28  ;;  %v73_v31 = vpop.permute.xlu2 %72  ;;  %vm304_vm2 = vcmp.eq.s32.totalorder %v627_v10, %v269_v8 }
  0x77   :  { %534 = vmatmul.msk.f32.vlgmr.msra.gmra.mxu0 %vm153_vm0, %v518_v30  ;;  %544 = vmatmul.msk.f32.vlgmr.msra.gmra.mxu3 %vm153_vm0, %v528_v29  ;;  %vm107_vm15 = vcmp.eq.s32.totalorder %v73_v31, %v52_v25 }
  0x78   :  { %v524_v53 = vsel %vm107_vm15, 1.0, %v655_v28  ;;  %vm317_vm15 = vcmp.eq.s32.totalorder %v627_v10, %v282_v24 }
  0x7c   :  { %v61_v33 = vpop.permute.xlu1 %60  ;;  %v58_v34 = vpop.permute.xlu0 %57 }
  0x7d   :  { %vm102_vm4 = vcmp.eq.s32.totalorder %v58_v34, %v52_v25  ;;  %vm103_vm6 = vcmp.eq.s32.totalorder %v61_v33, %v52_v25 }
  0x7e   :  { %v519_v35 = vsel %vm102_vm4, 1.0, %v655_v28  ;;  %v79_v36 = vpop.permute.xlu2 %78  ;;  %v520_v39 = vsel %vm103_vm6, 1.0, %v655_v28  ;;  %vm305_vm4 = vcmp.eq.s32.totalorder %v627_v10, %v270_v13  ;;  %vm313_vm6 = vcmp.eq.s32.totalorder %v627_v10, %v278_v15 }
  0x7f   :  { %535 = vmatmul.msk.f32.gmra.mxu0 %vm153_vm0, %v519_v35  ;;  %545 = vmatmul.msk.f32.gmra.mxu3 %vm153_vm0, %v529_v32  ;;  %vm109_vm5 = vcmp.eq.s32.totalorder %v79_v36, %v52_v25 }
  0x80   :  { %v526_v37 = vsel %vm109_vm5, 1.0, %v655_v28  ;;  %vm318_vm5 = vcmp.eq.s32.totalorder %v627_v10, %v283_v14 }
  0x84   :  { %v91_v38 = vpop.permute.xlu0 %90  ;;  %v67_v40 = vpop.permute.xlu1 %66 }
  0x85   :  { %vm113_vm7 = vcmp.eq.s32.totalorder %v91_v38, %v52_v25  ;;  %vm105_vm10 = vcmp.eq.s32.totalorder %v67_v40, %v52_v25 }
  0x86   :  { %v530_v41 = vsel %vm113_vm7, 1.0, %v655_v28  ;;  %v522_v47 = vsel %vm105_vm10, 1.0, %v655_v28  ;;  %vm306_vm7 = vcmp.eq.s32.totalorder %v627_v10, %v271_v16  ;;  %vm307_vm10 = vcmp.eq.s32.totalorder %v627_v10, %v272_v19 }
  0x87   :  { %536 = vmatmul.msk.f32.gmra.mxu0 %vm153_vm0, %v520_v39  ;;  %546 = vmatmul.msk.f32.gmra.mxu3 %vm153_vm0, %v530_v41 }
  0x8c   :  { %v70_v42 = vpop.permute.xlu0 %69  ;;  %v97_v45 = vpop.permute.xlu1 %96 }
  0x8d   :  { %vm115_vm11 = vcmp.eq.s32.totalorder %v97_v45, %v52_v25  ;;  %vm106_vm12 = vcmp.eq.s32.totalorder %v70_v42, %v52_v25 }
  0x8e   :  { %v532_v48 = vsel %vm115_vm11, 1.0, %v655_v28  ;;  %v523_v50 = vsel %vm106_vm12, 1.0, %v655_v28  ;;  %vm315_vm11 = vcmp.eq.s32.totalorder %v627_v10, %v280_v20  ;;  %vm308_vm12 = vcmp.eq.s32.totalorder %v627_v10, %v273_v21 }
  0x8f   :  { %537 = vmatmul.msk.f32.gmra.mxu0 %vm153_vm0, %v521_v43  ;;  %547 = vmatmul.msk.f32.gmra.mxu3 %vm153_vm0, %v531_v44 }
  0x94   :  { %v100_v46 = vpop.permute.xlu0 %99  ;;  %v76_v54 = vpop.permute.xlu1 %75 }
  0x95   :  { %vm116_vm13 = vcmp.eq.s32.totalorder %v100_v46, %v52_v25  ;;  %vm108_vm1 = vcmp.eq.s32.totalorder %v76_v54, %v52_v25 }
  0x96   :  { %v533_v51 = vsel %vm116_vm13, 1.0, %v655_v28  ;;  %v525_v55 = vsel %vm108_vm1, 1.0, %v655_v28  ;;  %vm316_vm13 = vcmp.eq.s32.totalorder %v627_v10, %v281_v22 }
  0x97   :  { %538 = vmatmul.msk.f32.gmra.mxu0 %vm153_vm0, %v522_v47  ;;  %548 = vmatmul.msk.f32.gmra.mxu3 %vm153_vm0, %v532_v48 }
  0x9c   :  { %v82_v49 = vpop.permute.xlu0 %81 }
  0x9d   :  { %vm110_vm14 = vcmp.eq.s32.totalorder %v82_v49, %v52_v25  ;;  %v275_v25 = vadd.s32 48, %v269_v8 }
  0x9e   :  { %v527_v52 = vsel %vm110_vm14, 1.0, %v655_v28  ;;  %vm309_vm14 = vcmp.eq.s32.totalorder %v627_v10, %v274_v23 }
  0x9f   :  { %539 = vmatmul.msk.f32.gmra.mxu0 %vm153_vm0, %v523_v50  ;;  %549 = vmatmul.msk.f32.gmra.mxu3 %vm153_vm0, %v533_v51  ;;  %vm310_vm1 = vcmp.eq.s32.totalorder %v627_v10, %v275_v25 }
  0xa7   :  { %540 = vmatmul.msk.f32.gmra.mxu0 %vm153_vm0, %v524_v53 }
  0xaf   :  { %541 = vmatmul.msk.f32.gmra.mxu0 %vm153_vm0, %v525_v55 }
  0xb7   :  { %542 = vmatmul.msk.f32.gmra.mxu0 %vm153_vm0, %v526_v37 }
  0xbf   :  { %543 = vmatmul.msk.f32.gmra.mxu0 %vm153_vm0, %v527_v52  ;;  %vm311_vm0 = vcmp.eq.s32.totalorder %v627_v10, %v276_v9 }
  0xf4   :  { %v757_v56 = vpop.f32.mrf.mxu0 }
  0xfa   :  { %v249_v57 = vpop.f32.mrf.mxu3 }
  0xfc   :  { %v222_v58 = vpop.f32.mrf.mxu0 }
 0x102   :  { %v252_v59 = vpop.f32.mrf.mxu3 }
 0x104   :  { %v225_v60 = vpop.f32.mrf.mxu0 }
 0x10a   :  { %v255_v61 = vpop.f32.mrf.mxu3 }
 0x10c   :  { %v228_v62 = vpop.f32.mrf.mxu0 }
 0x112   :  { %v258_v63 = vpop.f32.mrf.mxu3 }
 0x114   :  { %v231_v0 = vpop.f32.mrf.mxu0 }
 0x11a   :  { %v261_v1 = vpop.f32.mrf.mxu3 }
 0x11c   :  { %v234_v2 = vpop.f32.mrf.mxu0 }
 0x122   :  { %v264_v3 = vpop.f32.mrf.mxu3 }
 0x123   :  { %368 = vmatpush.msra.mxu1 %v264_v3  ;;  %586 = vmatpush.msra.mxu2 %v264_v3 }
 0x124   :  { %587 = vmatpush.msrb.mxu3 %v264_v3  ;;  %v237_v4 = vpop.f32.mrf.mxu0 }
 0x125   :  { %369 = vmatpush.msra.mxu1 %v261_v1  ;;  %588 = vmatpush.msra.mxu2 %v261_v1 }
 0x126   :  { %589 = vmatpush.msrb.mxu3 %v261_v1 }
 0x127   :  { %370 = vmatpush.msra.mxu1 %v258_v63  ;;  %590 = vmatpush.msra.mxu2 %v258_v63 }
 0x128   :  { %591 = vmatpush.msrb.mxu3 %v258_v63 }
 0x129   :  { %371 = vmatpush.msra.mxu1 %v255_v61  ;;  %592 = vmatpush.msra.mxu2 %v255_v61 }
 0x12a   :  { %593 = vmatpush.msrb.mxu3 %v255_v61 }
 0x12b   :  { %372 = vmatpush.msra.mxu1 %v252_v59  ;;  %594 = vmatpush.msra.mxu2 %v252_v59 }
 0x12c   :  { %595 = vmatpush.msrb.mxu3 %v252_v59  ;;  %v240_v5 = vpop.f32.mrf.mxu0 }
 0x12d   :  { %373 = vmatpush.msra.mxu1 %v249_v57  ;;  %596 = vmatpush.msra.mxu2 %v249_v57 }
 0x12e   :  { %597 = vmatpush.msrb.mxu3 %v249_v57 }
 0x134   :  { %v243_v6 = vpop.f32.mrf.mxu0 }
 0x13c   :  { %v246_v7 = vpop.f32.mrf.mxu0 }
 0x13d   :  { %374 = vmatpush.msra.mxu1 %v246_v7  ;;  %598 = vmatpush.msra.mxu2 %v246_v7 }
 0x13e   :  { %599 = vmatpush.msrb.mxu3 %v246_v7 }
 0x13f   :  { %375 = vmatpush.msra.mxu1 %v243_v6  ;;  %600 = vmatpush.msra.mxu2 %v243_v6 }
 0x140   :  { %601 = vmatpush.msrb.mxu3 %v243_v6 }
 0x141   :  { %376 = vmatpush.msra.mxu1 %v240_v5  ;;  %602 = vmatpush.msra.mxu2 %v240_v5 }
 0x142   :  { %603 = vmatpush.msrb.mxu3 %v240_v5 }
 0x143   :  { %377 = vmatpush.msra.mxu1 %v237_v4  ;;  %604 = vmatpush.msra.mxu2 %v237_v4 }
 0x144   :  { %605 = vmatpush.msrb.mxu3 %v237_v4 }
 0x145   :  { %378 = vmatpush.msra.mxu1 %v234_v2  ;;  %606 = vmatpush.msra.mxu2 %v234_v2 }
 0x146   :  { %607 = vmatpush.msrb.mxu3 %v234_v2 }
 0x147   :  { %379 = vmatpush.msra.mxu1 %v231_v0  ;;  %608 = vmatpush.msra.mxu2 %v231_v0 }
 0x148   :  { %609 = vmatpush.msrb.mxu3 %v231_v0 }
 0x149   :  { %380 = vmatpush.msra.mxu1 %v228_v62  ;;  %610 = vmatpush.msra.mxu2 %v228_v62 }
 0x14a   :  { %611 = vmatpush.msrb.mxu3 %v228_v62 }
 0x14b   :  { %381 = vmatpush.msra.mxu1 %v225_v60  ;;  %612 = vmatpush.msra.mxu2 %v225_v60 }
 0x14c   :  { %613 = vmatpush.msrb.mxu3 %v225_v60 }
 0x14d   :  { %382 = vmatpush.msra.mxu1 %v222_v58  ;;  %614 = vmatpush.msra.mxu2 %v222_v58 }
 0x14e   :  { %615 = vmatpush.msrb.mxu3 %v222_v58 }
 0x14f   :  { %383 = vmatpush.msra.mxu1 %v757_v56  ;;  %616 = vmatpush.msra.mxu2 %v757_v56 }
 0x150   :  { %617 = vmatpush.msrb.mxu3 %v757_v56  ;;  %573 = vmatmul.msk.f32.vlgmr.msra.gmra.mxu2 %vm311_vm0, %v656_v11 }
 0x151   :  { %566 = vmatmul.msk.f32.vlgmr.msra.gmra.mxu1 %vm304_vm2, %v656_v11  ;;  %580 = vmatmul.msk.f32.vlgmr.msrb.gmra.mxu3 %vm318_vm5, %v656_v11 }
 0x158   :  { %574 = vmatmul.msk.f32.gmra.mxu2 %vm312_vm3, %v656_v11 }
 0x159   :  { %567 = vmatmul.msk.f32.gmra.mxu1 %vm305_vm4, %v656_v11  ;;  %581 = vmatmul.msk.f32.gmra.mxu3 %vm319_vm8, %v656_v11 }
 0x160   :  { %575 = vmatmul.msk.f32.gmra.mxu2 %vm313_vm6, %v656_v11 }
 0x161   :  { %568 = vmatmul.msk.f32.gmra.mxu1 %vm306_vm7, %v656_v11 }
 0x168   :  { %576 = vmatmul.msk.f32.gmra.mxu2 %vm314_vm9, %v656_v11 }
 0x169   :  { %569 = vmatmul.msk.f32.gmra.mxu1 %vm307_vm10, %v656_v11 }
 0x170   :  { %577 = vmatmul.msk.f32.gmra.mxu2 %vm315_vm11, %v656_v11 }
 0x171   :  { %570 = vmatmul.msk.f32.gmra.mxu1 %vm308_vm12, %v656_v11 }
 0x178   :  { %578 = vmatmul.msk.f32.gmra.mxu2 %vm316_vm13, %v656_v11 }
 0x179   :  { %571 = vmatmul.msk.f32.gmra.mxu1 %vm309_vm14, %v656_v11 }
 0x180   :  { %579 = vmatmul.msk.f32.gmra.mxu2 %vm317_vm15, %v656_v11 }
 0x181   :  { %572 = vmatmul.msk.f32.gmra.mxu1 %vm310_vm1, %v656_v11 }
 0x1ce   :  { %v385_v26 = vpop.f32.mrf.mxu1 }
 0x1cf   :  { %484 = vst [vmem:[#allocation3] sm:$0xff] %v385_v26 }
 0x1d3   :  { %v406_v27 = vpop.f32.mrf.mxu2 }
 0x1d4   :  { %491 = vst [vmem:[#allocation3 + $0x38] sm:$0xff] %v406_v27  ;;  %v427_v30 = vpop.f32.mrf.mxu3 }
 0x1d5   :  { %498 = vst [vmem:[#allocation3 + $0x70] sm:$0xff] %v427_v30 }
 0x1d6   :  { %v388_v28 = vpop.f32.mrf.mxu1 }
 0x1d7   :  { %485 = vst [vmem:[#allocation3 + $0x8] sm:$0xff] %v388_v28 }
 0x1db   :  { %v409_v29 = vpop.f32.mrf.mxu2 }
 0x1dc   :  { %492 = vst [vmem:[#allocation3 + $0x40] sm:$0xff] %v409_v29  ;;  %v430_v33 = vpop.f32.mrf.mxu3 }
 0x1dd   :  { %499 = vst [vmem:[#allocation3 + $0x78] sm:$0xff] %v430_v33 }
 0x1de   :  { %v391_v31 = vpop.f32.mrf.mxu1 }
 0x1df   :  { %486 = vst [vmem:[#allocation3 + $0x10] sm:$0xff] %v391_v31 }
 0x1e3   :  { %v412_v32 = vpop.f32.mrf.mxu2 }
 0x1e4   :  { %493 = vst [vmem:[#allocation3 + $0x48] sm:$0xff] %v412_v32 }
 0x1e6   :  { %v394_v34 = vpop.f32.mrf.mxu1 }
 0x1e7   :  { %487 = vst [vmem:[#allocation3 + $0x18] sm:$0xff] %v394_v34 }
 0x1eb   :  { %v415_v35 = vpop.f32.mrf.mxu2 }
 0x1ec   :  { %494 = vst [vmem:[#allocation3 + $0x50] sm:$0xff] %v415_v35 }
 0x1ee   :  { %v397_v36 = vpop.f32.mrf.mxu1 }
 0x1ef   :  { %488 = vst [vmem:[#allocation3 + $0x20] sm:$0xff] %v397_v36 }
 0x1f3   :  { %v418_v37 = vpop.f32.mrf.mxu2 }
 0x1f4   :  { %495 = vst [vmem:[#allocation3 + $0x58] sm:$0xff] %v418_v37 }
 0x1f6   :  { %v400_v38 = vpop.f32.mrf.mxu1 }
 0x1f7   :  { %489 = vst [vmem:[#allocation3 + $0x28] sm:$0xff] %v400_v38 }
 0x1fb   :  { %v421_v39 = vpop.f32.mrf.mxu2 }
 0x1fc   :  { %496 = vst [vmem:[#allocation3 + $0x60] sm:$0xff] %v421_v39 }
 0x1fe   :  { %v403_v40 = vpop.f32.mrf.mxu1 }
 0x1ff   :  { %490 = vst [vmem:[#allocation3 + $0x30] sm:$0xff] %v403_v40 }
 0x203   :  { %v424_v41 = vpop.f32.mrf.mxu2 }
 0x204   :  { %497 = vst [vmem:[#allocation3 + $0x68] sm:$0xff] %v424_v41 }
 0x205   :  { %512 = dma.vmem_to_hbm [thread:$0]  %s505_s25, 2048, %s507_s28, [#allocation4], %s658_s29, %s658_s29, %s659_s30  }
 0x206   :  { %652 = dma.done.wait [#allocation4], 2048  }
 0x207   :  { %653 = vsyncadd [#allocation4], 4294965248 }
 0x208   :  { %517 = vsyncpa [#allocation4], 1 }

</bundles_post_ra>
